<compile_context>
chip_gen: v7x
topology: tpu7x:2x2x1
jax: 0.10.0
libtpu: 0.0.40
codegen_flags: <defaults>
</compile_context>

<pallas_src>
import functools

import jax
import jax.numpy as jnp
from jax.experimental import pallas as pl
from jax.experimental.pallas import tpu as pltpu

FC1_DIMS = 128
FC2_DIMS = 64
LANE = 128        # TPU lane width
SUBLANE = 16      # bf16 sublane packing (2 x 8)


def _round_up(n: int, m: int) -> int:
    return (n + m - 1) // m * m


def _mlp_kernel(x_ref, w1_ref, b1_ref, w2_ref, b2_ref, w3_ref, b3_ref, o_ref):
    """One batch tile: three chained MXU matmuls (bf16 operands, f32 acc)
    with f32 bias-add + ReLU on the VPU in between."""
    x = x_ref[...]
    h1 = jnp.dot(x, w1_ref[...], preferred_element_type=jnp.float32) + b1_ref[...]
    h1 = jnp.maximum(h1, 0.0).astype(w2_ref.dtype)
    h2 = jnp.dot(h1, w2_ref[...], preferred_element_type=jnp.float32) + b2_ref[...]
    h2 = jnp.maximum(h2, 0.0).astype(w3_ref.dtype)
    out = jnp.dot(h2, w3_ref[...], preferred_element_type=jnp.float32) + b3_ref[...]
    o_ref[...] = out.astype(o_ref.dtype)


@functools.partial(jax.jit, static_argnames=("block_b",))
def network_forward(x, params, *, block_b=256):
    """x: (B, input_dim) f32. params: dict of w1,b1,w2,b2,w3,b3 (f32, weights
    stored (in, out) i.e. transposed vs. nn.Linear). Returns (B, num_actions) f32."""
    w1, b1 = params["w1"], params["b1"]
    w2, b2 = params["w2"], params["b2"]
    w3, b3 = params["w3"], params["b3"]

    batch, input_dim = x.shape
    num_actions = w3.shape[1]
    compute_dtype = jnp.bfloat16

    # Lane-dense output: zero-pad fc3 out_features to a multiple of 128.
    out_pad = _round_up(max(num_actions, LANE), LANE)
    w3p = jnp.pad(w3, ((0, 0), (0, out_pad - num_actions)))
    b3p = jnp.pad(b3, ((0, 0), (0, out_pad - num_actions)))

    # Batch tiling: pad batch to a sublane multiple, tile so x/out stream while
    # the weights remain resident across grid steps.
    if batch >= block_b:
        tile_b = block_b
    else:
        tile_b = _round_up(batch, SUBLANE)
    padded_b = _round_up(batch, tile_b)
    if padded_b != batch:
        x = jnp.pad(x, ((0, padded_b - batch), (0, 0)))

    # bf16 operands for the MXU; biases kept f32 (bias-add / ReLU on the VPU in f32).
    x_c = x.astype(compute_dtype)
    w1_c = w1.astype(compute_dtype)
    w2_c = w2.astype(compute_dtype)
    w3_c = w3p.astype(compute_dtype)
    b1_f = b1.astype(jnp.float32)
    b2_f = b2.astype(jnp.float32)
    b3_f = b3p.astype(jnp.float32)

    grid = (padded_b // tile_b,)

    def resident(a):  # whole array, same block every step -> stays in VMEM
        return pl.BlockSpec(a.shape, lambda i: (0,) * a.ndim)

    flops = 2 * padded_b * (input_dim * FC1_DIMS + FC1_DIMS * FC2_DIMS + FC2_DIMS * out_pad)
    bytes_accessed = (
        padded_b * input_dim * 2                                              # x (bf16)
        + (input_dim * FC1_DIMS + FC1_DIMS * FC2_DIMS + FC2_DIMS * out_pad) * 2  # weights (bf16)
        + (FC1_DIMS + FC2_DIMS + out_pad) * 4                                 # biases (f32)
        + padded_b * out_pad * 4                                              # output (f32)
    )

    out = pl.pallas_call(
        _mlp_kernel,
        out_shape=jax.ShapeDtypeStruct((padded_b, out_pad), jnp.float32),
        grid=grid,
        in_specs=[
            pl.BlockSpec((tile_b, input_dim), lambda i: (i, 0)),
            resident(w1_c), resident(b1_f),
            resident(w2_c), resident(b2_f),
            resident(w3_c), resident(b3_f),
        ],
        out_specs=pl.BlockSpec((tile_b, out_pad), lambda i: (i, 0)),
        compiler_params=pltpu.CompilerParams(
            dimension_semantics=("parallel",),
        ),
        cost_estimate=pl.CostEstimate(
            flops=flops, transcendentals=0, bytes_accessed=bytes_accessed),
    )(x_c, w1_c, b1_f, w2_c, b2_f, w3_c, b3_f)

    return out[:batch, :num_actions]


def init_params(key, input_dim, num_actions):
    """Deterministic init mimicking PyTorch nn.Linear defaults:
    U(-1/sqrt(fan_in), 1/sqrt(fan_in)) for both weight and bias."""
    def linear(k, fan_in, fan_out):
        kw, kb = jax.random.split(k)
        bound = 1.0 / jnp.sqrt(fan_in)
        w = jax.random.uniform(kw, (fan_in, fan_out), jnp.float32, -bound, bound)
        b = jax.random.uniform(kb, (1, fan_out), jnp.float32, -bound, bound)
        return w, b

    k1, k2, k3 = jax.random.split(key, 3)
    w1, b1 = linear(k1, input_dim, FC1_DIMS)
    w2, b2 = linear(k2, FC1_DIMS, FC2_DIMS)
    w3, b3 = linear(k3, FC2_DIMS, num_actions)
    return {"w1": w1, "b1": b1, "w2": w2, "b2": b2, "w3": w3, "b3": b3}


def _reference_forward_f32(x, p):
    h1 = jnp.maximum(x @ p["w1"] + p["b1"], 0.0)
    h2 = jnp.maximum(h1 @ p["w2"] + p["b2"], 0.0)
    return h2 @ p["w3"] + p["b3"]


def _reference_forward_bf16(x, p):
    bf = jnp.bfloat16
    h1 = jnp.dot(x.astype(bf), p["w1"].astype(bf),
                 preferred_element_type=jnp.float32) + p["b1"]
    h1 = jnp.maximum(h1, 0.0).astype(bf)
    h2 = jnp.dot(h1, p["w2"].astype(bf),
                 preferred_element_type=jnp.float32) + p["b2"]
    h2 = jnp.maximum(h2, 0.0).astype(bf)
    return jnp.dot(h2, p["w3"].astype(bf),
                   preferred_element_type=jnp.float32) + p["b3"]


if __name__ == "__main__":
    # TODO(synk): only the forward pass is implemented; optim.Adam / MSELoss
    # training state has no kernel here.
    key = jax.random.PRNGKey(0)
    k_params, k_x, k_x2 = jax.random.split(key, 3)

    batch = 2
    input_dim = 8       # input_shape = (8,)
    num_actions = 4

    params = init_params(k_params, input_dim, num_actions)
    x = jax.random.normal(k_x, (batch, input_dim), jnp.float32)

    out = jax.block_until_ready(network_forward(x, params))
    assert out.shape == (batch, num_actions)

    # Tight check vs a matched bf16-operand / f32-accumulate reference,
    # looser check vs the pure-f32 PyTorch-style reference.
    ref_bf16 = _reference_forward_bf16(x, params)
    ref_f32 = _reference_forward_f32(x, params)
    assert jnp.allclose(out, ref_bf16, atol=1e-3, rtol=1e-3), "mismatch vs bf16 reference"
    assert jnp.allclose(out, ref_f32, atol=5e-2, rtol=5e-2), "mismatch vs f32 reference"

    # Exercise the multi-tile grid path (batch padding + weights resident
    # across grid steps).
    x2 = jax.random.normal(k_x2, (300, input_dim), jnp.float32)
    out2 = jax.block_until_ready(network_forward(x2, params, block_b=128))
    assert out2.shape == (300, num_actions)
    assert jnp.allclose(out2, _reference_forward_bf16(x2, params), atol=1e-3, rtol=1e-3)

    print("KERNEL_OK")
</pallas_src>

<mosaic_0001>
module attributes {stable_mosaic.version = 11 : i64} {
  func.func @_mlp_kernel(%arg0: i32, %arg1: memref<16x8xbf16, #tpu.memory_space<vmem>>, %arg2: memref<8x128xbf16, #tpu.memory_space<vmem>>, %arg3: memref<1x128xf32, #tpu.memory_space<vmem>>, %arg4: memref<128x64xbf16, #tpu.memory_space<vmem>>, %arg5: memref<1x64xf32, #tpu.memory_space<vmem>>, %arg6: memref<64x128xbf16, #tpu.memory_space<vmem>>, %arg7: memref<1x128xf32, #tpu.memory_space<vmem>>, %arg8: memref<16x128xf32, #tpu.memory_space<vmem>>) attributes {dimension_semantics = [#tpu.dimension_semantics<parallel>], iteration_bounds = array<i64: 1>, scalar_prefetch = 0 : i64, scratch_operands = 0 : i64, tpu.core_type = #tpu.core_type<tc>, window_params = [{transform_indices = @transform_0, window_bounds = array<i64: 16, 8>}, {pipeline_mode = #tpu.pipeline_mode<synchronous>, transform_indices = @transform_1, window_bounds = array<i64: 8, 128>}, {pipeline_mode = #tpu.pipeline_mode<synchronous>, transform_indices = @transform_2, window_bounds = array<i64: 1, 128>}, {pipeline_mode = #tpu.pipeline_mode<synchronous>, transform_indices = @transform_3, window_bounds = array<i64: 128, 64>}, {pipeline_mode = #tpu.pipeline_mode<synchronous>, transform_indices = @transform_4, window_bounds = array<i64: 1, 64>}, {pipeline_mode = #tpu.pipeline_mode<synchronous>, transform_indices = @transform_5, window_bounds = array<i64: 64, 128>}, {pipeline_mode = #tpu.pipeline_mode<synchronous>, transform_indices = @transform_6, window_bounds = array<i64: 1, 128>}, {transform_indices = @transform_7, window_bounds = array<i64: 16, 128>}]} {
    %c0 = arith.constant 0 : index
    %c0_0 = arith.constant 0 : index
    %0 = vector.load %arg1[%c0, %c0_0] : memref<16x8xbf16, #tpu.memory_space<vmem>>, vector<16x8xbf16>
    %c0_1 = arith.constant 0 : index
    %c0_2 = arith.constant 0 : index
    %1 = vector.load %arg2[%c0_1, %c0_2] : memref<8x128xbf16, #tpu.memory_space<vmem>>, vector<8x128xbf16>
    %cst = arith.constant dense<0.000000e+00> : vector<16x128xf32>
    %2 = tpu.matmul %0, %1, %cst {dimension_numbers = #tpu.dot_dimension_numbers<[1], [0], [0], [1], [0, 0, 1, 1], [], []>} : vector<16x8xbf16>, vector<8x128xbf16>, vector<16x128xf32> -> vector<16x128xf32>
    %c0_3 = arith.constant 0 : index
    %c0_4 = arith.constant 0 : index
    %3 = vector.load %arg3[%c0_3, %c0_4] : memref<1x128xf32, #tpu.memory_space<vmem>>, vector<1x128xf32>
    %4 = vector.broadcast %3 : vector<1x128xf32> to vector<16x128xf32>
    %5 = arith.addf %2, %4 : vector<16x128xf32>
    %cst_5 = arith.constant 0.000000e+00 : f32
    %6 = vector.broadcast %cst_5 : f32 to vector<16x128xf32>
    %7 = arith.maximumf %5, %6 : vector<16x128xf32>
    %8 = arith.truncf %7 : vector<16x128xf32> to vector<16x128xbf16>
    %c0_6 = arith.constant 0 : index
    %c0_7 = arith.constant 0 : index
    %9 = vector.load %arg4[%c0_6, %c0_7] : memref<128x64xbf16, #tpu.memory_space<vmem>>, vector<128x64xbf16>
    %cst_8 = arith.constant dense<0.000000e+00> : vector<16x64xf32>
    %10 = tpu.matmul %8, %9, %cst_8 {dimension_numbers = #tpu.dot_dimension_numbers<[1], [0], [0], [1], [0, 0, 1, 1], [], []>} : vector<16x128xbf16>, vector<128x64xbf16>, vector<16x64xf32> -> vector<16x64xf32>
    %c0_9 = arith.constant 0 : index
    %c0_10 = arith.constant 0 : index
    %11 = vector.load %arg5[%c0_9, %c0_10] : memref<1x64xf32, #tpu.memory_space<vmem>>, vector<1x64xf32>
    %12 = vector.broadcast %11 : vector<1x64xf32> to vector<16x64xf32>
    %13 = arith.addf %10, %12 : vector<16x64xf32>
    %cst_11 = arith.constant 0.000000e+00 : f32
    %14 = vector.broadcast %cst_11 : f32 to vector<16x64xf32>
    %15 = arith.maximumf %13, %14 : vector<16x64xf32>
    %16 = arith.truncf %15 : vector<16x64xf32> to vector<16x64xbf16>
    %c0_12 = arith.constant 0 : index
    %c0_13 = arith.constant 0 : index
    %17 = vector.load %arg6[%c0_12, %c0_13] : memref<64x128xbf16, #tpu.memory_space<vmem>>, vector<64x128xbf16>
    %cst_14 = arith.constant dense<0.000000e+00> : vector<16x128xf32>
    %18 = tpu.matmul %16, %17, %cst_14 {dimension_numbers = #tpu.dot_dimension_numbers<[1], [0], [0], [1], [0, 0, 1, 1], [], []>} : vector<16x64xbf16>, vector<64x128xbf16>, vector<16x128xf32> -> vector<16x128xf32>
    %c0_15 = arith.constant 0 : index
    %c0_16 = arith.constant 0 : index
    %19 = vector.load %arg7[%c0_15, %c0_16] : memref<1x128xf32, #tpu.memory_space<vmem>>, vector<1x128xf32>
    %20 = vector.broadcast %19 : vector<1x128xf32> to vector<16x128xf32>
    %21 = arith.addf %18, %20 : vector<16x128xf32>
    %c0_17 = arith.constant 0 : index
    %c0_18 = arith.constant 0 : index
    %22 = vector.load %arg8[%c0_17, %c0_18] : memref<16x128xf32, #tpu.memory_space<vmem>>, vector<16x128xf32>
    tpu.vector_store %arg8[%c0_17, %c0_18], %21 {strides = array<i32>} : memref<16x128xf32, #tpu.memory_space<vmem>>, vector<16x128xf32>,
    return
  }
  func.func @transform_0(%arg0: i32) -> (i32, i32) {
    %c0_i32 = arith.constant 0 : i32
    %c0_i32_0 = arith.constant 0 : i32
    return %arg0, %c0_i32 : i32, i32
  }
  func.func @transform_1(%arg0: i32) -> (i32, i32) {
    %c0_i32 = arith.constant 0 : i32
    %c0_i32_0 = arith.constant 0 : i32
    %c0_i32_1 = arith.constant 0 : i32
    return %c0_i32, %c0_i32_0 : i32, i32
  }
  func.func @transform_2(%arg0: i32) -> (i32, i32) {
    %c0_i32 = arith.constant 0 : i32
    %c0_i32_0 = arith.constant 0 : i32
    %c0_i32_1 = arith.constant 0 : i32
    return %c0_i32, %c0_i32_0 : i32, i32
  }
  func.func @transform_3(%arg0: i32) -> (i32, i32) {
    %c0_i32 = arith.constant 0 : i32
    %c0_i32_0 = arith.constant 0 : i32
    %c0_i32_1 = arith.constant 0 : i32
    return %c0_i32, %c0_i32_0 : i32, i32
  }
  func.func @transform_4(%arg0: i32) -> (i32, i32) {
    %c0_i32 = arith.constant 0 : i32
    %c0_i32_0 = arith.constant 0 : i32
    %c0_i32_1 = arith.constant 0 : i32
    return %c0_i32, %c0_i32_0 : i32, i32
  }
  func.func @transform_5(%arg0: i32) -> (i32, i32) {
    %c0_i32 = arith.constant 0 : i32
    %c0_i32_0 = arith.constant 0 : i32
    %c0_i32_1 = arith.constant 0 : i32
    return %c0_i32, %c0_i32_0 : i32, i32
  }
  func.func @transform_6(%arg0: i32) -> (i32, i32) {
    %c0_i32 = arith.constant 0 : i32
    %c0_i32_0 = arith.constant 0 : i32
    %c0_i32_1 = arith.constant 0 : i32
    return %c0_i32, %c0_i32_0 : i32, i32
  }
  func.func @transform_7(%arg0: i32) -> (i32, i32) {
    %c0_i32 = arith.constant 0 : i32
    %c0_i32_0 = arith.constant 0 : i32
    return %arg0, %c0_i32 : i32, i32
  }
}

</mosaic_0001>

<bundles_post_ra>
// kernel: network_forward.1
= control target key start
LH: loop header
LB: loop body
LE: loop exit
PB: predicated region body
PF: predicated region fallthrough
CT: control target
= control target key end

     0   :  { %vm46_vm0 = vcmask 1043456   ;;  %v386_v0 = vmov 0.0   ;;  %vm387_vm1 = vmmov 0   ;;  %vm42_vm2 = vcmask 64512   ;;  %s485_s1 = inlined_call_operand.vmem [shape: bf16[8,128], index: 1, kind: input, shape index: {}]   ;;  %s486_s0 = inlined_call_operand.vmem [shape: bf16[16,8], index: 0, kind: input, shape index: {}]   ;;  %s487_s3 = inlined_call_operand.vmem [shape: bf16[128,64], index: 3, kind: input, shape index: {}]   ;;  %s488_s5 = inlined_call_operand.vmem [shape: bf16[64,128], index: 5, kind: input, shape index: {}]   ;;  %s489_s2 = inlined_call_operand.vmem [shape: f32[1,128], index: 2, kind: input, shape index: {}]   ;;  %s490_s4 = inlined_call_operand.vmem [shape: f32[1,64], index: 4, kind: input, shape index: {}]   ;;  %s491_s6 = inlined_call_operand.vmem [shape: f32[1,128], index: 6, kind: input, shape index: {}]   ;;  %s492_s7 = inlined_call_operand.vmem [shape: f32[16,128], index: 7, kind: output, shape index: {}]  }
   0x1   :  { %333 = vmatprep.subr.bf16.mxu0 %v386_v0  ;;  %v29_v1 = vld [vmem:[%s485_s1] sm:$0xf]  ;;  %335 = vmatprep.mubr.msk.bf16.mxu0 %vm387_vm1, %v386_v0  ;;  %v375_v5 = vld [vmem:[%s487_s3 + $0x8] sm:$0xff]   ;;  %v376_v6 = vld [vmem:[%s487_s3 + $0x10] sm:$0xff]   ;;  %vm248_vm3 = vcmask 523264  }
   0x2   :  { %v48_v2 = vsel %vm46_vm0, %v29_v1, 0  ;;  %v373_v3 = vld [vmem:[%s486_s0] sm:$0xff]   ;;  %339 = vmatprep.subr.bf16.mxu1 %v386_v0  ;;  %355 = vmatprep.mubr.msk.bf16.mxu1 %vm387_vm1, %v386_v0  ;;  %v377_v7 = vld [vmem:[%s487_s3 + $0x18] sm:$0xff]   ;;  %v379_v9 = vld [vmem:[%s487_s3 + $0x28] sm:$0xff]  }
   0x3   :  { %334 = vmatpush3.bf16.msra.mxu0 %v48_v2  ;;  %v374_v4 = vld [vmem:[%s487_s3] sm:$0xff]   ;;  %v380_v10 = vld [vmem:[%s487_s3 + $0x30] sm:$0xff]   ;;  %v381_v11 = vld [vmem:[%s487_s3 + $0x38] sm:$0xff]  }
   0x4   :  { %359 = vmatprep.subr.bf16.mxu0 %v386_v0  ;;  %340 = vmatpush3.bf16.msra.mxu1 %v374_v4  ;;  %v378_v8 = vld [vmem:[%s487_s3 + $0x20] sm:$0xff]   ;;  %v383_v13 = vld [vmem:[%s488_s5 + $0x8] sm:$0xff]   ;;  %v384_v24 = vld [vmem:[%s488_s5 + $0x10] sm:$0xff]  }
   0x5   :  { %341 = vmatprep.subr.bf16.mxu1 %v386_v0  ;;  %v382_v12 = vld [vmem:[%s488_s5] sm:$0xff]   ;;  %v385_v25 = vld [vmem:[%s488_s5 + $0x18] sm:$0xff]  }
   0x6   :  { %336 = vmatmul.mubr.msk.bf16.vlgmr.msra.gmra.mrb[0].mxu0 %vm42_vm2, %v373_v3  ;;  %v299_v14 = vld [vmem:[%s489_s2] ss:$0 sm:$0xff] }
   0x7   :  { %367 = vmatprep.mubr.msk.bf16.mxu0 %vm387_vm1, %v386_v0  ;;  %360 = vmatpush3.bf16.msra.mxu0 %v382_v12  ;;  %v302_v26 = vld [vmem:[%s490_s4] ss:$0 sm:$0xff] }
   0x8   :  { %342 = vmatpush3.bf16.msra.mxu1 %v375_v5  ;;  %361 = vmatprep.subr.bf16.mxu0 %v386_v0  ;;  %v311_v36 = vld [vmem:[%s491_s6] ss:$0 sm:$0xff] }
   0x9   :  { %343 = vmatprep.subr.bf16.mxu1 %v386_v0 }
   0xb   :  { %362 = vmatpush3.bf16.msra.mxu0 %v383_v13 }
   0xc   :  { %344 = vmatpush3.bf16.msra.mxu1 %v376_v6  ;;  %363 = vmatprep.subr.bf16.mxu0 %v386_v0 }
   0xd   :  { %345 = vmatprep.subr.bf16.mxu1 %v386_v0 }
   0xf   :  { %364 = vmatpush3.bf16.msra.mxu0 %v384_v24 }
  0x10   :  { %346 = vmatpush3.bf16.msra.mxu1 %v377_v7  ;;  %365 = vmatprep.subr.bf16.mxu0 %v386_v0 }
  0x11   :  { %347 = vmatprep.subr.bf16.mxu1 %v386_v0 }
  0x13   :  { %366 = vmatpush3.bf16.msra.mxu0 %v385_v25 }
  0x14   :  { %348 = vmatpush3.bf16.msra.mxu1 %v378_v8 }
  0x15   :  { %349 = vmatprep.subr.bf16.mxu1 %v386_v0 }
  0x18   :  { %350 = vmatpush3.bf16.msra.mxu1 %v379_v9 }
  0x19   :  { %351 = vmatprep.subr.bf16.mxu1 %v386_v0 }
  0x1c   :  { %352 = vmatpush3.bf16.msra.mxu1 %v380_v10 }
  0x1d   :  { %353 = vmatprep.subr.bf16.mxu1 %v386_v0 }
  0x20   :  { %354 = vmatpush3.bf16.msra.mxu1 %v381_v11 }
  0xd9   :  { %v84_v15 = vpop.f32.mrb[0].mxu0 }
  0xda   :  { %v85_v16 = vadd.f32 %v299_v14, %v84_v15  ;;  %v337_v17 = vpop.f32.mrb[1].mxu0 }
  0xdb   :  { %v87_v18 = vpop.f32.mrb[2].mxu0 }
  0xdc   :  { %v88_v19 = vadd.f32 %v299_v14, %v87_v18  ;;  %v338_v20 = vpop.f32.mrb[3].mxu0  ;;  %v91_v21 = vmax.f32 %v85_v16, 0.0 }
  0xde   :  { %v92_v22 = vmax.f32 %v88_v19, 0.0 }
  0xe0   :  { %v93_v23 = vpack.c.bf16 %v92_v22, %v91_v21 }
  0xe2   :  { %356 = vmatmul.mubr.bf16.vlgmr.msra.gmra.mrb[0].mxu1 %v93_v23 }
 0x1b5   :  { %v199_v27 = vpop.f32.mrb[0].mxu1 }
 0x1b6   :  { %v200_v28 = vadd.f32 %v302_v26, %v199_v27  ;;  %v357_v29 = vpop.f32.mrb[1].mxu1 }
 0x1b7   :  { %v202_v30 = vpop.f32.mrb[2].mxu1 }
 0x1b8   :  { %v203_v31 = vadd.f32 %v302_v26, %v202_v30  ;;  %v358_v32 = vpop.f32.mrb[3].mxu1  ;;  %v206_v33 = vmax.f32 %v200_v28, 0.0 }
 0x1ba   :  { %v207_v34 = vmax.f32 %v203_v31, 0.0 }
 0x1bc   :  { %v208_v35 = vpack.c.bf16 %v207_v34, %v206_v33 }
 0x1be   :  { %368 = vmatmul.mubr.msk.bf16.vlgmr.msra.gmra.mrb[4].mxu0 %vm248_vm3, %v208_v35 }
 0x291   :  { %v286_v37 = vpop.f32.mrb[4].mxu0 }
 0x292   :  { %v287_v38 = vadd.f32 %v311_v36, %v286_v37  ;;  %v369_v39 = vpop.f32.mrb[5].mxu0 }
 0x293   :  { %v289_v40 = vpop.f32.mrb[6].mxu0 }
 0x294   :  { %293 = vst [vmem:[%s492_s7] sm:$0xff] %v287_v38  ;;  %v290_v41 = vadd.f32 %v311_v36, %v289_v40  ;;  %v370_v42 = vpop.f32.mrb[7].mxu0 }
 0x296   :  { %294 = vst [vmem:[%s492_s7 + $0x8] sm:$0xff] %v290_v41 }

</bundles_post_ra>
